<compile_context>
chip_gen: v6e
topology: v6e:2x2x1
jax: 0.10.0
libtpu: 0.0.40
codegen_flags: <defaults>
</compile_context>

<pallas_src>
import functools

import jax
import jax.numpy as jnp
import numpy as np
from jax import lax
from jax.experimental import pallas as pl
from jax.experimental.pallas import tpu as pltpu

LANE = 128      # TPU lane width (last dim of every VMEM block)
SUBLANE = 8     # f32 sublane packing


def _round_up(x, m):
    return ((x + m - 1) // m) * m


# ----------------------------- Pallas kernels -----------------------------

def linear_relu_kernel(x_ref, w_ref, b_ref, o_ref):
    # x: [TN, F], w: [F, HP], b: [1, HP]  ->  o: [TN, HP]
    y = jnp.dot(x_ref[...], w_ref[...], preferred_element_type=jnp.float32)
    o_ref[...] = jnp.maximum(y + b_ref[...], 0.0)


def linear_logsoftmax_kernel(x_ref, w_ref, b_ref, o_ref):
    # x: [TN, HP], w: [HP, CP], b: [1, CP] -> o: [TN, CP]
    # Padded class columns carry a -1e30 bias so they contribute exp(.) == 0.
    y = jnp.dot(x_ref[...], w_ref[...], preferred_element_type=jnp.float32)
    y = y + b_ref[...]
    m = jnp.max(y, axis=-1, keepdims=True)
    z = y - m
    lse = jnp.log(jnp.sum(jnp.exp(z), axis=-1, keepdims=True))
    o_ref[...] = z - lse


def dual_layer_kernel(row_ref, col_ref,              # scalar prefetch (SMEM, int32[E_pad])
                      h_ref, raw_ref,                # [NB, 8, HP] resident slabs
                      wgr_ref, wgc_ref, bg_ref,      # [1, HP], [1, HP], [1, 1]
                      ew_ref,                        # SMEM f32[E_pad]: nd[r]*nd[c]/in_deg[c]
                      o_ref,                         # [NB, 8, HP] resident out (acc slab 0)
                      acc1_ref,                      # [NB, 8, HP] scratch (acc slab 1)
                      *, edge_tile, eps, hp):
    """One DualChannelLayer (gather + gate + message + mean-scatter) + eps*raw."""
    t = pl.program_id(0)

    @pl.when(t == 0)
    def _init():
        o_ref[...] = jnp.zeros_like(o_ref)
        acc1_ref[...] = jnp.zeros_like(acc1_ref)

    wgr = wgr_ref[...]                                   # [1, HP]
    wgc = wgc_ref[...]                                   # [1, HP]
    bg = bg_ref[...]                                     # [1, 1]
    sub = lax.broadcasted_iota(jnp.int32, (SUBLANE, hp), 0)   # sublane ids (hoisted)
    base = t * edge_tile

    def one_edge(e_glob, acc_ref):
        # INVARIANT (lets us drop the bounds guard): padded edges have
        # ew_ref[e] == 0 and row/col == 0 (valid node), so msg == 0 exactly.
        r = row_ref[e_glob]                              # source node index
        c = col_ref[e_glob]                              # target node index
        rb, rs = r // SUBLANE, r % SUBLANE
        cb, cs = c // SUBLANE, c % SUBLANE
        # fused gather: dynamic leading-axis block read + sublane select/reduce
        hr = jnp.sum(jnp.where(sub == rs, h_ref[rb], 0.0),
                     axis=0, keepdims=True)              # [1, HP] = h[row]
        hc = jnp.sum(jnp.where(sub == cs, h_ref[cb], 0.0),
                     axis=0, keepdims=True)              # [1, HP] = h[col]
        # gate on VPU + XLU lane-reduce + EUP tanh (no MXU matvec of width 1)
        g = jnp.tanh(jnp.sum(hr * wgr + hc * wgc, axis=-1, keepdims=True)
                     + bg)                               # [1, 1]
        # edge weight already folds nd[row] * nd[col] * 1/in_deg[col]  (mean)
        # TODO(synk): dropout on the edge weight is stochastic; inference identity.
        msg = (g * ew_ref[e_glob]) * (hr + hc)           # [1, HP]  message()
        acc_ref[cb] = acc_ref[cb] + jnp.where(sub == cs, msg, 0.0)

    def pair_body(p, carry):
        e0 = base + 2 * p
        one_edge(e0, o_ref)           # even edge -> slab 0 (output buffer)
        one_edge(e0 + 1, acc1_ref)    # odd edge  -> slab 1 (scratch): breaks the
        return carry                  # RMW store chain across adjacent edges

    lax.fori_loop(0, edge_tile // 2, pair_body, 0, unroll=4)   # 8 edges per body

    @pl.when(t == pl.num_programs(0) - 1)
    def _finalize():
        # sum the two accumulator slabs + eps * raw residual
        o_ref[...] = eps * raw_ref[...] + (o_ref[...] + acc1_ref[...])


# ----------------------------- model wrapper -------------------------------

def init_params(key, num_features, num_hidden, num_classes, layer_num):
    def xavier_normal(k, out_dim, in_dim, gain=1.414):
        std = gain * np.sqrt(2.0 / (in_dim + out_dim))
        return std * jax.random.normal(k, (out_dim, in_dim), jnp.float32)

    keys = jax.random.split(key, 4 + 2 * layer_num)
    params = {
        "w1": xavier_normal(keys[0], num_hidden, num_features),       # [H, F]
        "b1": 0.01 * jax.random.normal(keys[1], (1, num_hidden), jnp.float32),
        "w2": xavier_normal(keys[2], num_classes, num_hidden),        # [C, H]
        "b2": 0.01 * jax.random.normal(keys[3], (1, num_classes), jnp.float32),
        "gate_w": [],
        "gate_b": [],
    }
    for i in range(layer_num):
        params["gate_w"].append(
            xavier_normal(keys[4 + 2 * i], 1, 2 * num_hidden))         # [1, 2H]
        params["gate_b"].append(
            0.01 * jax.random.normal(keys[5 + 2 * i], (1, 1), jnp.float32))
    return params


def dual_channel_forward(h, params, edge_index, eps, layer_num,
                         *, node_tile=256, edge_tile=4096):
    f32 = jnp.float32
    N, F = h.shape
    H = params["w1"].shape[0]                   # true hidden width
    C = params["w2"].shape[0]                   # true number of classes
    HP = _round_up(max(H, LANE), LANE)          # lane-dense hidden
    CP = _round_up(max(C, LANE), LANE)          # lane-dense classes

    row = edge_index[0].astype(jnp.int32)
    col = edge_index[1].astype(jnp.int32)
    E = int(row.shape[0])

    TN = _round_up(min(node_tile, _round_up(N, SUBLANE)), SUBLANE)
    N_pad = _round_up(N, TN)
    NB = N_pad // SUBLANE
    TE = _round_up(max(2, min(edge_tile, E)), 2)        # even -> pair loop
    E_pad = _round_up(E, TE)

    # ---- plain-JAX glue: degrees, edge weights, zero-padding, weight prep ----
    deg = jnp.zeros((N_pad,), f32).at[row].add(1.0)
    norm_deg = jnp.clip(deg, 1.0, None) ** -0.5              # degree(row)^-0.5
    in_deg = jnp.zeros((N_pad,), f32).at[col].add(1.0)
    inv_in_deg = 1.0 / jnp.clip(in_deg, 1.0, None)           # aggr='mean'

    # 1/in_deg[col] folded into the per-edge weight (no idv slab / finalize mul)
    edge_w = norm_deg[row] * norm_deg[col] * inv_in_deg[col]  # [E]
    edge_w_p = jnp.zeros((E_pad,), f32).at[:E].set(edge_w)    # padded edges -> 0
    row_p = jnp.zeros((E_pad,), jnp.int32).at[:E].set(row)    # padded edges -> node 0
    col_p = jnp.zeros((E_pad,), jnp.int32).at[:E].set(col)

    # F.dropout on the input: inference-mode identity.
    x_pad = jnp.zeros((N_pad, F), f32).at[:N, :].set(h)
    w1p = jnp.zeros((F, HP), f32).at[:, :H].set(params["w1"].T)
    b1p = jnp.zeros((1, HP), f32).at[:, :H].set(params["b1"])
    w2p = jnp.zeros((HP, CP), f32).at[:H, :C].set(params["w2"].T)
    b2p = jnp.full((1, CP), -1e30, f32).at[:, :C].set(params["b2"])

    # TODO(synk): per-generation tuning — v5e/v6e (128 MiB) can go ~100 MiB,
    # v7x physical VMEM is 64 MiB.
    VMEM_LIMIT = 64 * 1024 * 1024

    lin_params = pltpu.CompilerParams(dimension_semantics=("parallel",),
                                      vmem_limit_bytes=VMEM_LIMIT)

    # ---- t1 + ReLU, tiled over node tiles (parallel axis) ----
    h1 = pl.pallas_call(
        linear_relu_kernel,
        grid=(N_pad // TN,),
        in_specs=[pl.BlockSpec((TN, F), lambda i: (i, 0)),
                  pl.BlockSpec((F, HP), lambda i: (0, 0)),
                  pl.BlockSpec((1, HP), lambda i: (0, 0))],
        out_specs=pl.BlockSpec((TN, HP), lambda i: (i, 0)),
        out_shape=jax.ShapeDtypeStruct((N_pad, HP), f32),
        compiler_params=lin_params,
    )(x_pad, w1p, b1p)

    raw3 = h1.reshape(NB, SUBLANE, HP)          # layout-identical reshape
    hcur3 = raw3

    layer_cost = pl.CostEstimate(
        flops=int(48 * E * HP),
        transcendentals=int(E),
        bytes_accessed=int(4 * N_pad * HP * 4 + 3 * E_pad * 4))

    for i in range(layer_num):
        wg = params["gate_w"][i]                             # [1, 2H]
        wgr = jnp.zeros((1, HP), f32).at[:, :H].set(wg[:, :H])   # multiplies h[row]
        wgc = jnp.zeros((1, HP), f32).at[:, :H].set(wg[:, H:])   # multiplies h[col]
        bg = params["gate_b"][i].reshape(1, 1)

        grid_spec = pltpu.PrefetchScalarGridSpec(
            num_scalar_prefetch=2,                           # row_p, col_p -> SMEM
            grid=(E_pad // TE,),
            in_specs=[
                pl.BlockSpec((NB, SUBLANE, HP), lambda e, *_: (0, 0, 0)),  # h (resident)
                pl.BlockSpec((NB, SUBLANE, HP), lambda e, *_: (0, 0, 0)),  # raw (resident)
                pl.BlockSpec((1, HP), lambda e, *_: (0, 0)),               # gate w (row half)
                pl.BlockSpec((1, HP), lambda e, *_: (0, 0)),               # gate w (col half)
                pl.BlockSpec((1, 1), lambda e, *_: (0, 0)),                # gate bias
                pl.BlockSpec(memory_space=pltpu.MemorySpace.SMEM),         # edge weights
            ],
            out_specs=pl.BlockSpec((NB, SUBLANE, HP), lambda e, *_: (0, 0, 0)),
            scratch_shapes=[pltpu.VMEM((NB, SUBLANE, HP), f32)],           # acc slab 1
        )
        hcur3 = pl.pallas_call(
            functools.partial(dual_layer_kernel, edge_tile=TE, eps=eps, hp=HP),
            grid_spec=grid_spec,
            out_shape=jax.ShapeDtypeStruct((NB, SUBLANE, HP), f32),
            compiler_params=pltpu.CompilerParams(
                dimension_semantics=("arbitrary",),   # reduction into resident out
                vmem_limit_bytes=VMEM_LIMIT),
            cost_estimate=layer_cost,
        )(row_p, col_p, hcur3, raw3, wgr, wgc, bg, edge_w_p)

    # ---- t2 + log_softmax, tiled over node tiles (parallel axis) ----
    out_pad = pl.pallas_call(
        linear_logsoftmax_kernel,
        grid=(N_pad // TN,),
        in_specs=[pl.BlockSpec((TN, HP), lambda i: (i, 0)),
                  pl.BlockSpec((HP, CP), lambda i: (0, 0)),
                  pl.BlockSpec((1, CP), lambda i: (0, 0))],
        out_specs=pl.BlockSpec((TN, CP), lambda i: (i, 0)),
        out_shape=jax.ShapeDtypeStruct((N_pad, CP), f32),
        compiler_params=lin_params,
    )(hcur3.reshape(N_pad, HP), w2p, b2p)

    return out_pad[:N, :C]


# ----------------------------- pure-JAX reference --------------------------

def reference_forward(h, params, edge_index, eps, layer_num):
    N = h.shape[0]
    H = params["w1"].shape[0]
    row, col = edge_index[0], edge_index[1]
    deg = jnp.zeros((N,), jnp.float32).at[row].add(1.0)
    nd = jnp.clip(deg, 1.0, None) ** -0.5
    in_deg = jnp.clip(jnp.zeros((N,), jnp.float32).at[col].add(1.0), 1.0, None)

    h1 = jax.nn.relu(h @ params["w1"].T + params["b1"][0])
    raw = h1
    hcur = h1
    for i in range(layer_num):
        wg = params["gate_w"][i][0]
        bg = params["gate_b"][i][0, 0]
        hr, hc = hcur[row], hcur[col]
        g = jnp.tanh(jnp.concatenate([hr, hc], axis=1) @ wg + bg)
        norm = g * nd[row] * nd[col]
        msg = norm[:, None] * (hr + hc)
        agg = jnp.zeros((N, H), jnp.float32).at[col].add(msg) / in_deg[:, None]
        hcur = eps * raw + agg
    y = hcur @ params["w2"].T + params["b2"][0]
    return jax.nn.log_softmax(y, axis=1)


# ----------------------------------- main -----------------------------------

if __name__ == "__main__":
    N, F_DIM, HID, CLS = 16, 8, 32, 4
    LAYER_NUM, EPS = 2, 0.3

    key = jax.random.PRNGKey(0)
    k_x, k_p = jax.random.split(key)

    # deterministic bidirectional ring graph: E = 2 * N edges
    src = jnp.arange(N, dtype=jnp.int32)
    dst = (src + 1) % N
    edge_index = jnp.stack([jnp.concatenate([src, dst]),
                            jnp.concatenate([dst, src])])     # [2, 2N]

    x = jax.random.normal(k_x, (N, F_DIM), jnp.float32)
    params = init_params(k_p, F_DIM, HID, CLS, LAYER_NUM)

    # small tiles so the toy run exercises multi-step grids, the pl.when
    # init/finalize accumulator path, and the two-slab sum (defaults:
    # node_tile=256, edge_tile=4096).
    out = dual_channel_forward(x, params, edge_index, EPS, LAYER_NUM,
                               node_tile=8, edge_tile=16)
    out = jax.block_until_ready(out)

    ref = jax.block_until_ready(
        reference_forward(x, params, edge_index, EPS, LAYER_NUM))
    np.testing.assert_allclose(np.asarray(out), np.asarray(ref),
                               rtol=1e-4, atol=1e-4)
    assert out.shape == (N, CLS)
    print("KERNEL_OK")
</pallas_src>

<mosaic_0001>
module attributes {stable_mosaic.version = 11 : i64} {
  func.func @linear_relu_kernel(%arg0: i32, %arg1: memref<8x8xf32, #tpu.memory_space<vmem>>, %arg2: memref<8x128xf32, #tpu.memory_space<vmem>>, %arg3: memref<1x128xf32, #tpu.memory_space<vmem>>, %arg4: memref<8x128xf32, #tpu.memory_space<vmem>>) attributes {dimension_semantics = [#tpu.dimension_semantics<parallel>], iteration_bounds = array<i64: 2>, scalar_prefetch = 0 : i64, scratch_operands = 0 : i64, tpu.core_type = #tpu.core_type<tc>, window_params = [{transform_indices = @transform_0, window_bounds = array<i64: 8, 8>}, {pipeline_mode = #tpu.pipeline_mode<synchronous>, transform_indices = @transform_1, window_bounds = array<i64: 8, 128>}, {pipeline_mode = #tpu.pipeline_mode<synchronous>, transform_indices = @transform_2, window_bounds = array<i64: 1, 128>}, {transform_indices = @transform_3, window_bounds = array<i64: 8, 128>}]} {
    %c0 = arith.constant 0 : index
    %c0_0 = arith.constant 0 : index
    %0 = vector.load %arg1[%c0, %c0_0] : memref<8x8xf32, #tpu.memory_space<vmem>>, vector<8x8xf32>
    %c0_1 = arith.constant 0 : index
    %c0_2 = arith.constant 0 : index
    %1 = vector.load %arg2[%c0_1, %c0_2] : memref<8x128xf32, #tpu.memory_space<vmem>>, vector<8x128xf32>
    %cst = arith.constant dense<0.000000e+00> : vector<8x128xf32>
    %2 = tpu.matmul %0, %1, %cst {dimension_numbers = #tpu.dot_dimension_numbers<[1], [0], [0], [1], [0, 0, 1, 1], [], []>} : vector<8x8xf32>, vector<8x128xf32>, vector<8x128xf32> -> vector<8x128xf32>
    %c0_3 = arith.constant 0 : index
    %c0_4 = arith.constant 0 : index
    %3 = vector.load %arg3[%c0_3, %c0_4] : memref<1x128xf32, #tpu.memory_space<vmem>>, vector<1x128xf32>
    %4 = vector.broadcast %3 : vector<1x128xf32> to vector<8x128xf32>
    %5 = arith.addf %2, %4 : vector<8x128xf32>
    %cst_5 = arith.constant 0.000000e+00 : f32
    %6 = vector.broadcast %cst_5 : f32 to vector<8x128xf32>
    %7 = arith.maximumf %5, %6 : vector<8x128xf32>
    %c0_6 = arith.constant 0 : index
    %c0_7 = arith.constant 0 : index
    %8 = vector.load %arg4[%c0_6, %c0_7] : memref<8x128xf32, #tpu.memory_space<vmem>>, vector<8x128xf32>
    tpu.vector_store %arg4[%c0_6, %c0_7], %7 {strides = array<i32>} : memref<8x128xf32, #tpu.memory_space<vmem>>, vector<8x128xf32>,
    return
  }
  func.func @transform_0(%arg0: i32) -> (i32, i32) {
    %c0_i32 = arith.constant 0 : i32
    %c0_i32_0 = arith.constant 0 : i32
    return %arg0, %c0_i32 : i32, i32
  }
  func.func @transform_1(%arg0: i32) -> (i32, i32) {
    %c0_i32 = arith.constant 0 : i32
    %c0_i32_0 = arith.constant 0 : i32
    %c0_i32_1 = arith.constant 0 : i32
    return %c0_i32, %c0_i32_0 : i32, i32
  }
  func.func @transform_2(%arg0: i32) -> (i32, i32) {
    %c0_i32 = arith.constant 0 : i32
    %c0_i32_0 = arith.constant 0 : i32
    %c0_i32_1 = arith.constant 0 : i32
    return %c0_i32, %c0_i32_0 : i32, i32
  }
  func.func @transform_3(%arg0: i32) -> (i32, i32) {
    %c0_i32 = arith.constant 0 : i32
    %c0_i32_0 = arith.constant 0 : i32
    return %arg0, %c0_i32 : i32, i32
  }
}

</mosaic_0001>

<bundles_post_ra>
// kernel: tpu_custom_call.1
= control target key start
LH: loop header
LB: loop body
LE: loop exit
PB: predicated region body
PF: predicated region fallthrough
CT: control target
= control target key end

     0   :  { %8 = vsyncpa [#allocation3], 0  ;;  %s562_s0 = inlined_call_operand.vmem [shape: f32[16,8], index: 0, kind: input, shape index: {}]   ;;  %s563_s1 = inlined_call_operand.vmem [shape: f32[8,128], index: 1, kind: input, shape index: {}]   ;;  %s564_s2 = inlined_call_operand.vmem [shape: f32[1,128], index: 2, kind: input, shape index: {}]   ;;  %s565_s3 = inlined_call_operand.hbm [shape: f32[16,128], index: 3, kind: output, shape index: {}]  }
   0x1   :  { %10 = vsyncpa [#allocation3 + $0x1], 0  ;;  %s469_s12 = smov 0   ;;  %s471_s13 = smov 0  }
   0x2   :  { %s473_s14 = smov 0   ;;  %s475_s15 = smov 0  }
   0x3 LB: > { %s490_s16 = sadd.s32 4294967295, %s444_s15   ;;  %s324_s17 = sadd.s32 4294967294, %s444_s15   ;;  %s444_s15 = sphi %s475_s15, %s571_s15   ;;  %s440_s14 = sphi %s473_s14, %s570_s14   ;;  %s436_s13 = sphi %s471_s13, %s569_s13   ;;  %s432_s12 = sphi %s469_s12, %s568_s12  }
   0x4   : > { %s494_s18 = sadd.s32 1, %s444_s15   ;;  %s91_s19 = sadd.s32 1, %s440_s14 }
   0x5   : > { %s88_s20 = ssub.s32 %s444_s15, %s494_s18  ;;  %p101_p0 = scmp.ne.s32.totalorder %s440_s14, %s436_s13 }
   0x6   : > { %p89_p1 = scmp.eq.s32.totalorder %s88_s20, 0  ;;  %p102_p2 = scmp.eq.s32.totalorder %s490_s16, 1 }
   0x7   : > { %p107_p3 = scmp.ne.s32.totalorder %s436_s13, %s432_s12  ;;  %p108_p4 = scmp.eq.s32.totalorder %s324_s17, 1 }
   0x8   : > { %s505_s21 = scalar_select %p89_p1, %s440_s14, %s91_s19  }
   0x9   : > { %p507_p5 = por %p102_p2, %p101_p0  ;;  %p511_p6 = por %p108_p4, %p107_p3 }
   0xa   : > { %p327_p7 = scmp.ge.s32.totalorder %s444_s15, 1  ;;  %p139_p8 = scmp.lt.s32.totalorder %s444_s15, 3 }
   0xc   : > { %p140_p9 = pnand %p327_p7, %p139_p8 }
   0xd   : > { %p162_p10 = scmp.lt.s32.totalorder (!%p140_p9), %s490_s16, 1  ;;  %s159_s4 = sand.u32 (!%p140_p9), 1, %s436_s13  }
   0xe   : > { %143 = sbr.rel (%p140_p9) target bundleno = 234 (0xea), region = 32  ;;  %s328_s5 = sshll.u32 (!%p140_p9), %s159_s4, 3 }
   0xf   : > { %s333_s8 = sshll.u32 (!%p140_p9), %s490_s16, 7  ;;  %s161_s9 = scalar_lea.vmem (!%p140_p9), [#allocation2], %s328_s5 }
  0x10   : > { %s265_s10 = sshll.u32 (!%p140_p9), %s161_s9, 4  ;;  %s263_s19 = scalar_lea.hbm (!%p140_p9), %s565_s3, %s333_s8  ;;  %s266_s10 = int_to_ptr.vmem [resolvable:$true] %s265_s10 }
  0x11   : > { %s252_s20 = scalar_lea.sflag (!%p140_p9), [#allocation3], %s159_s4  ;;  %s384_s24 = scalar_lea.vmem (!%p140_p9), %s266_s10, 128 }
  0x12   : > { %p385_p11 = scmp.ne.s32.totalorder (!%p140_p9), %s266_s10, %s384_s24  ;;  %s448_s25 = smov (!%p140_p9), [#allocation2]  }
  0x13   : > { %v167_v0 = vld [vmem:[%s563_s1] sm:$0xff]  ;;  %v446_v1 = vmov 0.0   ;;  %vm447_vm0 = vmmov 0   ;;  %s163_s26 = scalar_select %p162_p10, %s490_s16, 1  ;;  %vm175_vm1 = vcmask 64512  }
  0x14   : > { %338 = vmatprep.subr.mxu0 %v446_v1  ;;  %340 = vmatprep.mubr.msk.f32.mxu0 %vm447_vm0, %v446_v1  ;;  %v330_v3 = vld [vmem:[%s564_s2] ss:$0 sm:$0xff]  ;;  %p386_p12 = pnand %p385_p11, %p507_p5 }
  0x15   : > { %339 = vmatpush3.msra.mxu0 %v167_v0  ;;  %s329_s27 = sshll.u32 %s163_s26, 3  ;;  %s388_s26 = sshll.u32 %s448_s25, 4  ;;  %s389_s26 = int_to_ptr.vmem [resolvable:$false] %s388_s26 }
  0x16   : > { %s165_s30 = scalar_lea.vmem %s562_s0, %s329_s27  ;;  %p387_p13 = pneg %p386_p12 }
  0x17   : > { %v166_v2 = vld [vmem:[%s165_s30] sm:$0xff]  ;;  %s390_s16 = scalar_lea.vmem %s389_s26, 256  ;;  %p391_p0 = scmp.lt.s32.totalorder %s266_s10, %s389_s26 }
  0x18   : > { %341 = vmatmul.mubr.msk.f32.vlgmr.msra.gmra.mxu0 %vm175_vm1, %v166_v2  ;;  %p392_p1 = scmp.lt.s32.totalorder %s390_s16, %s384_s24 }
  0x1a   : > { %p393_p2 = por %p392_p1, %p391_p0 }
  0x1c   : > { %p394_p3 = pnand %p393_p2, %p387_p13 }
  0xd8   : > { %v245_v4 = vpop.f32.mrf.mxu0 }
  0xd9   : > { %v246_v5 = vadd.f32 %v330_v3, %v245_v4 }
  0xda   : > { %v342_v6 = vpop.f32.mrf.mxu0 }
  0xdb   : > { %v249_v7 = vmax.f32 %v246_v5, 0.0 }
  0xdd   : > { %250 = vst [vmem:[%s161_s9] sm:$0xff] %v249_v7 }
  0xde   : > { %397 = shalt.err (!%p394_p3)
}
  0xdf   : > { %s398_s27 = scalar_lea.hbm %s263_s19, 128  ;;  %s402_s30 = scalar_lea.hbm %s565_s3, 256 }
  0xe0   : > { %p399_p4 = scmp.ne.s32.totalorder %s263_s19, %s398_s27  ;;  %p403_p9 = scmp.lt.s32.totalorder %s263_s19, %s565_s3 }
  0xe1   : > { %p404_p10 = scmp.lt.s32.totalorder %s402_s30, %s398_s27 }
  0xe2   : > { %p400_p7 = pnand %p399_p4, %p507_p5 }
  0xe3   : > { %p405_p11 = por %p404_p10, %p403_p9 }
  0xe4   : > { %p401_p8 = pneg %p400_p7 }
  0xe6   : > { %p406_p12 = pnand %p405_p11, %p401_p8 }
  0xe8   : > { %409 = shalt.err (!%p406_p12)
}
  0xe9   : > { %343 = dma.vmem_to_hbm [thread:$0]  (%p507_p5), %s266_s10, 128, %s263_s19, %s252_s20  }
  0xea PF: > { %p349_p13 = scmp.ge.s32.totalorder %s444_s15, 2  ;;  %s277_s6 = sand.u32 1, %s432_s12  }
  0xeb   : > { %s278_s7 = scalar_lea.sflag [#allocation3], %s277_s6 }
  0xec   : > { %p346_p0 = pnand %p349_p13, %p511_p6 }
  0xee   : > { %p347_p1 = pneg %p346_p0 }
  0xf0   : > { %427 = dma.done.wait (%p347_p1), %s278_s7, 128  }
  0xf1   : > { %429 = vsyncadd (%p347_p1), %s278_s7, 4294967168  ;;  %p13_p2 = scmp.ge.s32.totalorder %s494_s18, 4   ;;  %s568_s12 = smov %s436_s13 }
  0xf2   : > { %s569_s13 = smov %s440_s14  ;;  %s570_s14 = smov %s505_s21 }
  0xf3   : > { %s571_s15 = smov %s494_s18  ;;  %15 = sbr.rel (!%p13_p2) target bundleno = 3 (0x3), region = 67 }
  0xf8   :  { %283 = vsyncpa [#allocation3], 1 }
  0xf9   :  { %285 = vsyncpa [#allocation3 + $0x1], 1 }

</bundles_post_ra>
